<compile_context>
chip_gen: v6e
topology: v6e:2x2x1
jax: 0.10.0
libtpu: 0.0.40
codegen_flags: <defaults>
</compile_context>

<pallas_src>
import jax
import jax.numpy as jnp
from jax.experimental import pallas as pl
from jax.experimental.pallas import tpu as pltpu

N_FEATURES = 4    # CartPole observation size
HIDDEN     = 32   # fc1 out_features from the module
N_ACTIONS  = 2    # CartPole action space
BATCH      = 2    # small example batch (typical single-env usage)


def actor_forward_kernel(x_ref, w1_ref, b1_ref, w2_ref, b2_ref, out_ref):
    # Natural layout:
    #   x_ref : (TB, F)   w1_ref : (F, H)   b1_ref : (1, H)
    #   w2_ref: (H, A)    b2_ref : (1, A)   out_ref: (TB, A)
    x = x_ref[...]                                                    # (TB, F)
    h = jnp.dot(x, w1_ref[...],
                preferred_element_type=jnp.float32) + b1_ref[...]     # (TB, H)
    h = jnp.maximum(h, 0.0)                                           # relu
    z = jnp.dot(h, w2_ref[...],
                preferred_element_type=jnp.float32) + b2_ref[...]     # (TB, A)

    n_act = out_ref.shape[-1]
    if n_act == 2:
        # Binary softmax == sigmoid of the logit difference.
        # Sums to 1 by construction; no cross-lane (XLU) reductions.
        d = z[:, 0:1] - z[:, 1:2]                                     # (TB, 1)
        p0 = 1.0 / (1.0 + jnp.exp(-d))                                # stable
        out_ref[:, 0:1] = p0
        out_ref[:, 1:2] = 1.0 - p0
    else:
        # General exact softmax over the action axis.
        m = jnp.max(z, axis=-1, keepdims=True)
        e = jnp.exp(z - m)
        out_ref[...] = e / jnp.sum(e, axis=-1, keepdims=True)


def actor_forward(x, w1, b1, w2, b2, *, tile_b=1024):
    """x: (B, F) f32. w1: (F, H), b1: (1, H), w2: (H, A), b2: (1, A).

    Returns softmax probabilities of shape (B, A)."""
    assert tile_b % 8 == 0
    B, F = x.shape
    H = w1.shape[1]
    A = w2.shape[1]

    # One grid step for B <= tile_b (block == full array, no padding needed);
    # otherwise tile at tile_b rows (multiple of 8 sublanes).
    tb = B if B <= tile_b else tile_b
    n_tiles = pl.cdiv(B, tb)

    cost = pl.CostEstimate(
        flops=2 * B * (F * H + H * A),
        transcendentals=B if A == 2 else B * A,
        bytes_accessed=4 * (B * F + F * H + H + H * A + A + B * A),
    )

    return pl.pallas_call(
        actor_forward_kernel,
        out_shape=jax.ShapeDtypeStruct((B, A), jnp.float32),
        grid=(n_tiles,),
        in_specs=[
            pl.BlockSpec((tb, F), lambda i: (i, 0)),   # x tiles over batch
            pl.BlockSpec((F, H), lambda i: (0, 0)),    # params stay resident
            pl.BlockSpec((1, H), lambda i: (0, 0)),
            pl.BlockSpec((H, A), lambda i: (0, 0)),
            pl.BlockSpec((1, A), lambda i: (0, 0)),
        ],
        out_specs=pl.BlockSpec((tb, A), lambda i: (i, 0)),
        compiler_params=pltpu.CompilerParams(
            dimension_semantics=("parallel",)),
        cost_estimate=cost,
    )(x, w1, b1, w2, b2)


def init_params(key, n_features=N_FEATURES, hidden=HIDDEN, n_actions=N_ACTIONS):
    # Deterministic init mimicking torch.nn.Linear default:
    # U(-1/sqrt(fan_in), 1/sqrt(fan_in)). Weights stored as (in, out) so they
    # feed the kernel directly (no per-call transposes).
    k1, k2, k3, k4 = jax.random.split(key, 4)
    bound1 = 1.0 / jnp.sqrt(jnp.float32(n_features))
    bound2 = 1.0 / jnp.sqrt(jnp.float32(hidden))
    w1 = jax.random.uniform(k1, (n_features, hidden), jnp.float32, -bound1, bound1)
    b1 = jax.random.uniform(k2, (1, hidden),          jnp.float32, -bound1, bound1)
    w2 = jax.random.uniform(k3, (hidden, n_actions),  jnp.float32, -bound2, bound2)
    b2 = jax.random.uniform(k4, (1, n_actions),       jnp.float32, -bound2, bound2)
    return w1, b1, w2, b2


def _reference(x, w1, b1, w2, b2):
    h = jnp.maximum(x @ w1 + b1, 0.0)
    return jax.nn.softmax(h @ w2 + b2, axis=-1)


if __name__ == "__main__":
    key = jax.random.PRNGKey(0)
    kx, kp, kb = jax.random.split(key, 3)
    w1, b1, w2, b2 = init_params(kp)

    # Small batch matching the module's typical usage (single env step).
    x_small = jax.random.normal(kx, (BATCH, N_FEATURES), jnp.float32)
    probs_small = jax.block_until_ready(actor_forward(x_small, w1, b1, w2, b2))
    ref_small = _reference(x_small, w1, b1, w2, b2)
    assert probs_small.shape == (BATCH, N_ACTIONS)
    assert jnp.allclose(probs_small, ref_small, atol=1e-3, rtol=1e-3)
    assert jnp.allclose(jnp.sum(probs_small, axis=-1), 1.0, atol=1e-3)

    # Larger batch (many environment states per pallas_call; weights resident
    # in VMEM, single grid step at B <= 1024).
    x_big = jax.random.normal(kb, (1024, N_FEATURES), jnp.float32)
    probs_big = jax.block_until_ready(actor_forward(x_big, w1, b1, w2, b2))
    ref_big = _reference(x_big, w1, b1, w2, b2)
    assert probs_big.shape == (1024, N_ACTIONS)
    assert jnp.allclose(probs_big, ref_big, atol=1e-3, rtol=1e-3)
    assert jnp.allclose(jnp.sum(probs_big, axis=-1), 1.0, atol=1e-3)

    # TODO(synk): learn() (Adam update) and choose_action() (Categorical
    # sampling) are host/driver logic, not part of forward(); not kernelized.
    print("KERNEL_OK")
</pallas_src>

<mosaic_0001>
module attributes {stable_mosaic.version = 11 : i64} {
  func.func @actor_forward_kernel(%arg0: i32, %arg1: memref<2x4xf32, #tpu.memory_space<vmem>>, %arg2: memref<4x32xf32, #tpu.memory_space<vmem>>, %arg3: memref<1x32xf32, #tpu.memory_space<vmem>>, %arg4: memref<32x2xf32, #tpu.memory_space<vmem>>, %arg5: memref<1x2xf32, #tpu.memory_space<vmem>>, %arg6: memref<2x2xf32, #tpu.memory_space<vmem>>) attributes {dimension_semantics = [#tpu.dimension_semantics<parallel>], iteration_bounds = array<i64: 1>, scalar_prefetch = 0 : i64, scratch_operands = 0 : i64, tpu.core_type = #tpu.core_type<tc>, window_params = [{transform_indices = @transform_0, window_bounds = array<i64: 2, 4>}, {pipeline_mode = #tpu.pipeline_mode<synchronous>, transform_indices = @transform_1, window_bounds = array<i64: 4, 32>}, {pipeline_mode = #tpu.pipeline_mode<synchronous>, transform_indices = @transform_2, window_bounds = array<i64: 1, 32>}, {pipeline_mode = #tpu.pipeline_mode<synchronous>, transform_indices = @transform_3, window_bounds = array<i64: 32, 2>}, {pipeline_mode = #tpu.pipeline_mode<synchronous>, transform_indices = @transform_4, window_bounds = array<i64: 1, 2>}, {transform_indices = @transform_5, window_bounds = array<i64: 2, 2>}]} {
    %c0 = arith.constant 0 : index
    %c0_0 = arith.constant 0 : index
    %0 = vector.load %arg1[%c0, %c0_0] : memref<2x4xf32, #tpu.memory_space<vmem>>, vector<2x4xf32>
    %c0_1 = arith.constant 0 : index
    %c0_2 = arith.constant 0 : index
    %1 = vector.load %arg2[%c0_1, %c0_2] : memref<4x32xf32, #tpu.memory_space<vmem>>, vector<4x32xf32>
    %cst = arith.constant dense<0.000000e+00> : vector<2x32xf32>
    %2 = tpu.matmul %0, %1, %cst {dimension_numbers = #tpu.dot_dimension_numbers<[1], [0], [0], [1], [0, 0, 1, 1], [], []>} : vector<2x4xf32>, vector<4x32xf32>, vector<2x32xf32> -> vector<2x32xf32>
    %c0_3 = arith.constant 0 : index
    %c0_4 = arith.constant 0 : index
    %3 = vector.load %arg3[%c0_3, %c0_4] : memref<1x32xf32, #tpu.memory_space<vmem>>, vector<1x32xf32>
    %4 = vector.broadcast %3 : vector<1x32xf32> to vector<2x32xf32>
    %5 = arith.addf %2, %4 : vector<2x32xf32>
    %cst_5 = arith.constant 0.000000e+00 : f32
    %6 = vector.broadcast %cst_5 : f32 to vector<2x32xf32>
    %7 = arith.maximumf %5, %6 : vector<2x32xf32>
    %c0_6 = arith.constant 0 : index
    %c0_7 = arith.constant 0 : index
    %8 = vector.load %arg4[%c0_6, %c0_7] : memref<32x2xf32, #tpu.memory_space<vmem>>, vector<32x2xf32>
    %cst_8 = arith.constant dense<0.000000e+00> : vector<2x2xf32>
    %9 = tpu.matmul %7, %8, %cst_8 {dimension_numbers = #tpu.dot_dimension_numbers<[1], [0], [0], [1], [0, 0, 1, 1], [], []>} : vector<2x32xf32>, vector<32x2xf32>, vector<2x2xf32> -> vector<2x2xf32>
    %c0_9 = arith.constant 0 : index
    %c0_10 = arith.constant 0 : index
    %10 = vector.load %arg5[%c0_9, %c0_10] : memref<1x2xf32, #tpu.memory_space<vmem>>, vector<1x2xf32>
    %11 = vector.broadcast %10 : vector<1x2xf32> to vector<2x2xf32>
    %12 = arith.addf %9, %11 : vector<2x2xf32>
    %13 = vector.extract_strided_slice %12 {offsets = [0, 0], sizes = [2, 1], strides = [1, 1]} : vector<2x2xf32> to vector<2x1xf32>
    %14 = vector.extract_strided_slice %12 {offsets = [0, 1], sizes = [2, 1], strides = [1, 1]} : vector<2x2xf32> to vector<2x1xf32>
    %15 = arith.subf %13, %14 : vector<2x1xf32>
    %cst_11 = arith.constant 0.000000e+00 : f32
    %16 = vector.broadcast %cst_11 : f32 to vector<2x1xf32>
    %17 = arith.subf %16, %15 : vector<2x1xf32>
    %18 = math.exp %17 : vector<2x1xf32>
    %cst_12 = arith.constant 1.000000e+00 : f32
    %19 = vector.broadcast %cst_12 : f32 to vector<2x1xf32>
    %20 = arith.addf %19, %18 : vector<2x1xf32>
    %cst_13 = arith.constant 1.000000e+00 : f32
    %21 = vector.broadcast %cst_13 : f32 to vector<2x1xf32>
    %22 = arith.divf %21, %20 : vector<2x1xf32>
    %c0_14 = arith.constant 0 : index
    %c0_15 = arith.constant 0 : index
    %23 = vector.load %arg6[%c0_14, %c0_15] : memref<2x2xf32, #tpu.memory_space<vmem>>, vector<2x1xf32>
    tpu.vector_store %arg6[%c0_14, %c0_15], %22 {strides = array<i32>} : memref<2x2xf32, #tpu.memory_space<vmem>>, vector<2x1xf32>,
    %cst_16 = arith.constant 1.000000e+00 : f32
    %24 = vector.broadcast %cst_16 : f32 to vector<2x1xf32>
    %25 = arith.subf %24, %22 : vector<2x1xf32>
    %c0_17 = arith.constant 0 : index
    %c1 = arith.constant 1 : index
    %26 = vector.load %arg6[%c0_17, %c1] : memref<2x2xf32, #tpu.memory_space<vmem>>, vector<2x1xf32>
    tpu.vector_store %arg6[%c0_17, %c1], %25 {strides = array<i32>} : memref<2x2xf32, #tpu.memory_space<vmem>>, vector<2x1xf32>,
    return
  }
  func.func @transform_0(%arg0: i32) -> (i32, i32) {
    %c0_i32 = arith.constant 0 : i32
    %c0_i32_0 = arith.constant 0 : i32
    return %arg0, %c0_i32 : i32, i32
  }
  func.func @transform_1(%arg0: i32) -> (i32, i32) {
    %c0_i32 = arith.constant 0 : i32
    %c0_i32_0 = arith.constant 0 : i32
    %c0_i32_1 = arith.constant 0 : i32
    return %c0_i32, %c0_i32_0 : i32, i32
  }
  func.func @transform_2(%arg0: i32) -> (i32, i32) {
    %c0_i32 = arith.constant 0 : i32
    %c0_i32_0 = arith.constant 0 : i32
    %c0_i32_1 = arith.constant 0 : i32
    return %c0_i32, %c0_i32_0 : i32, i32
  }
  func.func @transform_3(%arg0: i32) -> (i32, i32) {
    %c0_i32 = arith.constant 0 : i32
    %c0_i32_0 = arith.constant 0 : i32
    %c0_i32_1 = arith.constant 0 : i32
    return %c0_i32, %c0_i32_0 : i32, i32
  }
  func.func @transform_4(%arg0: i32) -> (i32, i32) {
    %c0_i32 = arith.constant 0 : i32
    %c0_i32_0 = arith.constant 0 : i32
    %c0_i32_1 = arith.constant 0 : i32
    return %c0_i32, %c0_i32_0 : i32, i32
  }
  func.func @transform_5(%arg0: i32) -> (i32, i32) {
    %c0_i32 = arith.constant 0 : i32
    %c0_i32_0 = arith.constant 0 : i32
    return %arg0, %c0_i32 : i32, i32
  }
}

</mosaic_0001>

<bundles_post_ra>
// kernel: tpu_custom_call.1
= control target key start
LH: loop header
LB: loop body
LE: loop exit
PB: predicated region body
PF: predicated region fallthrough
CT: control target
= control target key end

     0   :  { %vm34_vm0 = vcmask 1043456   ;;  %vm30_vm1 = vcmask 31744   ;;  %v287_v1 = vmov 0.0   ;;  %vm288_vm2 = vmmov 0   ;;  %s349_s0 = inlined_call_operand.vmem [shape: f32[2,4], index: 0, kind: input, shape index: {}]   ;;  %s350_s1 = inlined_call_operand.vmem [shape: f32[4,32], index: 1, kind: input, shape index: {}]   ;;  %s351_s2 = inlined_call_operand.vmem [shape: f32[1,32], index: 2, kind: input, shape index: {}]   ;;  %s352_s3 = inlined_call_operand.vmem [shape: f32[32,2], index: 3, kind: input, shape index: {}]   ;;  %s353_s4 = inlined_call_operand.vmem [shape: f32[1,2], index: 4, kind: input, shape index: {}]   ;;  %s354_s5 = inlined_call_operand.hbm [shape: f32[2,2], index: 5, kind: output, shape index: {}]  }
   0x1   :  { %v22_v0 = vld [vmem:[%s350_s1] sm:$0xf]  ;;  %240 = vmatprep.subr.mxu0 %v287_v1  ;;  %242 = vmatprep.mubr.msk.f32.mxu0 %vm288_vm2, %v287_v1  ;;  %v112_v3 = vld [vmem:[%s352_s3 + $0x18] sm:$0xff] }
   0x2   :  { %v21_v2 = vld [vmem:[%s349_s0] sm:$0x3]  ;;  %241 = vmatpush3.msk.msra.mxu0 %vm34_vm0, %v22_v0  ;;  %245 = vmatprep.subr.mxu1 %v287_v1 }
   0x3   :  { %10 = vsyncpa [#allocation3], 0  ;;  %243 = vmatmul.mubr.msk.f32.vlgmr.msra.gmra.mxu0 %vm30_vm1, %v21_v2  ;;  %246 = vmatpush3.msra.mxu1 %v112_v3  ;;  %v111_v4 = vld [vmem:[%s352_s3 + $0x10] sm:$0xff]  ;;  %v110_v5 = vld [vmem:[%s352_s3 + $0x8] sm:$0xff]  ;;  %vm120_vm3 = vcmask 261120   ;;  %s289_s7 = smov 127  }
   0x4   :  { %247 = vmatprep.subr.mxu1 %v287_v1  ;;  %253 = vmatprep.mubr.msk.f32.mxu1 %vm288_vm2, %v287_v1  ;;  %v109_v6 = vld [vmem:[%s352_s3] sm:$0xff]  ;;  %vm205_vm4 = vcmask 1024   ;;  %s291_s3 = smov [#allocation2]   ;;  %vm212_vm5 = vcmask 9224  }
   0x5   :  { %248 = vmatpush3.msra.mxu1 %v111_v4  ;;  %v228_v7 = vld [vmem:[%s351_s2] ss:$0 sm:$0xff]  ;;  %s290_s2 = smov 1  }
   0x6   :  { %249 = vmatprep.subr.mxu1 %v287_v1  ;;  %v231_v12 = vld [vmem:[%s353_s4] ss:$0 sm:$0xff]  ;;  %s220_s4 = sshll.u32 %s291_s3, 4  ;;  %s221_s4 = int_to_ptr.vmem [resolvable:$true] %s220_s4 }
   0x7   :  { %250 = vmatpush3.msra.mxu1 %v110_v5  ;;  %s265_s8 = scalar_lea.vmem %s221_s4, 32  ;;  %p270_p1 = scmp.lt.s32.totalorder %s221_s4, %s221_s4 }
   0x8   :  { %251 = vmatprep.subr.mxu1 %v287_v1  ;;  %p266_p0 = scmp.ne.s32.totalorder %s221_s4, %s265_s8  ;;  %p271_p2 = scmp.lt.s32.totalorder %s265_s8, %s265_s8 }
   0x9   :  { %252 = vmatpush3.msra.mxu1 %v109_v6 }
   0xa   :  { %p272_p3 = por %p271_p2, %p270_p1 }
   0xc   :  { %p273_p4 = pnand %p272_p3, %p266_p0 }
  0xc3   :  { %v104_v8 = vpop.f32.mrf.mxu0 }
  0xc4   :  { %v105_v9 = vadd.f32 %v228_v7, %v104_v8 }
  0xc5   :  { %v244_v10 = vpop.f32.mrf.mxu0 }
  0xc6   :  { %v108_v11 = vmax.f32 %v105_v9, 0.0 }
  0xc8   :  { %254 = vmatmul.mubr.msk.f32.vlgmr.msra.gmra.mxu1 %vm120_vm3, %v108_v11 }
 0x188   :  { %v190_v13 = vpop.f32.mrf.mxu1 }
 0x189   :  { %v191_v14 = vadd.f32 %v231_v12, %v190_v13 }
 0x18a   :  { %v255_v15 = vpop.f32.mrf.mxu1 }
 0x18b   :  { %195 = vrot.lane.b32.xlu0 %v191_v14, %s289_s7 }
 0x1fd   :  { %v196_v16 = vpop.permute.xlu0 %195 }
 0x1fe   :  { %v198_v17 = vsub.f32 %v191_v14, %v196_v16 }
 0x200   :  { %v199_v18 = vsub.f32 0.0, %v198_v17 }
 0x202   :  { %v200_v19 = vmul.f32 1.442695, %v199_v18 }
 0x204   :  { %261 = vpow2.f32 %v200_v19 }
 0x211   :  { %v262_v20 = vpop.eup %261 }
 0x212   :  { %v202_v21 = vadd.f32 1.0, %v262_v20 }
 0x214   :  { %263 = vrcp.f32 %v202_v21 }
 0x221   :  { %v264_v22 = vpop.eup %263 }
 0x222   :  { %v207_v23 = vsub.f32 1.0, %v264_v22  ;;  %206 = vst.msk [vmem:[#allocation2] sm:$0x3] %vm205_vm4, %v264_v22 }
 0x224   :  { %209 = vrot.lane.b32.xlu0 %v207_v23, %s290_s2 }
 0x296   :  { %v210_v24 = vpop.permute.xlu0 %209 }
 0x297   :  { %213 = vst.msk [vmem:[#allocation2] sm:$0x3] %vm212_vm5, %v210_v24 }
 0x298   :  { %276 = shalt.err (!%p273_p4)
}
 0x299   :  { %223 = dma.vmem_to_hbm [thread:$0]  %s221_s4, 32, %s354_s5, [#allocation3]  }
 0x29a   :  { %285 = dma.done.wait [#allocation3], 32  }
 0x29b   :  { %286 = vsyncadd [#allocation3], 4294967264 }
 0x29c   :  { %227 = vsyncpa [#allocation3], 1 }

</bundles_post_ra>
